<compile_context>
chip_gen: v7x
topology: tpu7x:2x2x1
jax: 0.10.0
libtpu: 0.0.40
codegen_flags: <defaults>
</compile_context>

<pallas_src>
import jax
import jax.numpy as jnp
from jax.experimental import pallas as pl
from jax.experimental.pallas import tpu as pltpu


# ----------------------------------------------------------------------------- helpers
def _round_up(n, m):
    return ((n + m - 1) // m) * m


def _vmem_capacity_bytes():
    """Physical VMEM per TensorCore; conservative fallback if the query fails."""
    try:
        return int(pltpu.get_tpu_info().vmem_capacity_bytes)
    except Exception:
        return 64 * 1024 * 1024  # v7x-sized (most constrained real device)


def _aligned_tile(total, cap, unit=128):
    """Largest multiple-of-`unit` divisor of `total` that is <= cap.

    `total` is already a multiple of `unit` (we pad to 128 in prepare)."""
    cap = max(unit, min(cap, total))
    best = unit
    d = unit
    while d <= cap:
        if total % d == 0:
            best = d
        d += unit
    return best


def _pick_block_b(B, cap_b):
    """Batch tile: biggest tile <= cap_b whose padding waste stays <= ~12.5% of B."""
    B8 = _round_up(max(B, 1), 8)
    if B8 <= cap_b:
        return B8
    bb = cap_b
    while bb > 8:
        waste = _round_up(B8, bb) - B8
        if waste * 8 <= B8:
            return bb
        bb //= 2
    return 8


def _choose_tiles(B, Fp, Cp, budget_bytes, itemsize, small_vmem):
    """Pick (block_b, block_k, block_c) that fit the VMEM budget.

    Generation-aware starting caps: v7x (64 MiB VMEM, 2 TCs) gets smaller tiles;
    v5e/v6e (128 MiB) get large batch tiles since the x stream is the mem-bound one."""
    cap_b = 256 if small_vmem else 1024
    cap_c = 256 if small_vmem else 512
    cap_k = 2048

    tb = tk = tc = None
    for _ in range(64):
        tb = _pick_block_b(B, cap_b)
        tk = _aligned_tile(Fp, cap_k)
        tc = _aligned_tile(Cp, cap_c)
        # double-buffered x and w blocks (compute dtype) + f32 out (x2), bias, acc scratch
        fp = (2 * tb * tk + 2 * tk * tc) * itemsize + (2 * tb * tc + 2 * tc + tb * tc) * 4
        if fp <= budget_bytes:
            return tb, tk, tc
        if cap_k > 256:
            cap_k //= 2
        elif cap_b > 128:
            cap_b //= 2
        elif cap_c > 128:
            cap_c //= 2
        elif cap_k > 128:
            cap_k //= 2
        else:
            break
    return tb, tk, tc  # smallest config; vmem_limit_bytes still protects us


def _spec_maybe_single_buffered(block_shape, index_map, single_buffer):
    """BlockSpec that drops the second pipeline buffer for grid-invariant operands."""
    if single_buffer and hasattr(pl, "Buffered"):
        try:
            return pl.BlockSpec(block_shape, index_map, pipeline_mode=pl.Buffered(1))
        except TypeError:
            pass
    return pl.BlockSpec(block_shape, index_map)


# ----------------------------------------------------------------------------- kernels
def _linear_bias_kernel(x_ref, w_ref, b_ref, o_ref):
    # Whole problem resident in VMEM (grid-less fast path).
    y = jnp.dot(x_ref[...], w_ref[...], preferred_element_type=jnp.float32)
    o_ref[...] = (y + b_ref[...]).astype(o_ref.dtype)


def _linear_acc_kernel(x_ref, w_ref, b_ref, o_ref, acc_ref):
    # Tiled path: grid = (batch, class, feature); feature (K) is the reduction axis.
    k = pl.program_id(2)

    @pl.when(k == 0)
    def _init():
        acc_ref[...] = jnp.zeros_like(acc_ref)

    acc_ref[...] += jnp.dot(x_ref[...], w_ref[...], preferred_element_type=jnp.float32)

    @pl.when(k == pl.num_programs(2) - 1)
    def _finalize():
        o_ref[...] = (acc_ref[...] + b_ref[...]).astype(o_ref.dtype)


# ----------------------------------------------------------------------------- wrappers
def prepare_full_layer_params(weight, bias, *, param_dtype=jnp.float32):
    """Hoisted parameter prep: transpose + pad W to lane-dense [Fp, Cp], pad b to [1, Cp].

    Call once (e.g. at parameter load) and reuse the result across forward calls.
    weight: [C, F] (PyTorch nn.Linear convention), bias: [C]."""
    C, F = weight.shape
    assert bias.shape == (C,)
    Fp = _round_up(F, 128)
    Cp = _round_up(C, 128)
    wp = jnp.zeros((Fp, Cp), param_dtype).at[:F, :C].set(weight.T.astype(param_dtype))
    bp = jnp.zeros((1, Cp), jnp.float32).at[0, :C].set(bias.astype(jnp.float32))
    return wp, bp


def full_layer_apply(x, wp, bp, num_classes, *, force_tiled=False, tile_overrides=None):
    """y = x @ W.T + b using prepared (padded, pre-transposed) params wp [Fp,Cp], bp [1,Cp]."""
    B, F = x.shape
    Fp, Cp = wp.shape
    assert F <= Fp and num_classes <= Cp and bp.shape == (1, Cp)

    out_dtype = x.dtype
    compute_dtype = wp.dtype
    itemsize = jnp.dtype(compute_dtype).itemsize

    capacity = _vmem_capacity_bytes()
    budget = int(capacity * 0.8)
    vmem_limit = int(min(capacity - (4 << 20), 100 << 20))
    small_vmem = capacity < (96 << 20)          # v7x-class VMEM
    max_single_b = 256 if small_vmem else 512

    def _pad_cast(arr, rows, cols):
        if arr.shape == (rows, cols) and arr.dtype == compute_dtype:
            return arr
        return (jnp.zeros((rows, cols), compute_dtype)
                .at[: arr.shape[0], : arr.shape[1]]
                .set(arr.astype(compute_dtype)))

    B8 = _round_up(B, 8)
    single_bytes = (B8 * Fp + Fp * Cp) * itemsize + (B8 * Cp + Cp) * 4
    use_single = (not force_tiled
                  and tile_overrides is None
                  and B <= max_single_b
                  and single_bytes <= min(budget, 48 << 20))

    if use_single:
        # Whole problem fits comfortably in VMEM: grid-less call, no pipeline overhead.
        xs = _pad_cast(x, B8, Fp)
        out = pl.pallas_call(
            _linear_bias_kernel,
            out_shape=jax.ShapeDtypeStruct((B8, Cp), out_dtype),
            in_specs=[
                pl.BlockSpec(memory_space=pltpu.MemorySpace.VMEM),
                pl.BlockSpec(memory_space=pltpu.MemorySpace.VMEM),
                pl.BlockSpec(memory_space=pltpu.MemorySpace.VMEM),
            ],
            out_specs=pl.BlockSpec(memory_space=pltpu.MemorySpace.VMEM),
            compiler_params=pltpu.CompilerParams(vmem_limit_bytes=vmem_limit),
        )(xs, wp, bp)
        return out[:B, :num_classes]

    # ---- fully tiled path: B x C x K grid, bounded VMEM regardless of layer size ----
    if tile_overrides is not None:
        tb, tk, tc = tile_overrides
    else:
        tb, tk, tc = _choose_tiles(B, Fp, Cp, budget, itemsize, small_vmem)
    assert Fp % tk == 0 and Cp % tc == 0 and tb % 8 == 0

    Bp = _round_up(B8, tb)
    gb, gc, gk = Bp // tb, Cp // tc, Fp // tk
    xs = _pad_cast(x, Bp, Fp)

    def _build(allow_single_buffer):
        w_invariant = allow_single_buffer and gc == 1 and gk == 1
        b_invariant = allow_single_buffer and gc == 1
        return pl.pallas_call(
            _linear_acc_kernel,
            out_shape=jax.ShapeDtypeStruct((Bp, Cp), out_dtype),
            grid_spec=pltpu.PrefetchScalarGridSpec(
                num_scalar_prefetch=0,
                grid=(gb, gc, gk),
                in_specs=[
                    pl.BlockSpec((tb, tk), lambda i, j, k: (i, k)),
                    _spec_maybe_single_buffered((tk, tc), lambda i, j, k: (k, j), w_invariant),
                    _spec_maybe_single_buffered((1, tc), lambda i, j, k: (0, j), b_invariant),
                ],
                out_specs=pl.BlockSpec((tb, tc), lambda i, j, k: (i, j)),
                scratch_shapes=[pltpu.VMEM((tb, tc), jnp.float32)],
            ),
            compiler_params=pltpu.CompilerParams(
                dimension_semantics=("parallel", "parallel", "arbitrary"),
                vmem_limit_bytes=vmem_limit,
            ),
        )

    try:
        out = _build(True)(xs, wp, bp)
    except Exception:
        # Fall back gracefully if single-buffered pipeline_mode is unsupported here.
        out = _build(False)(xs, wp, bp)

    return out[:B, :num_classes]


def full_layer_forward(x, weight, bias, *, param_dtype=jnp.float32, **kwargs):
    """One-shot convenience (prep + apply). For repeated calls, hoist the prep."""
    wp, bp = prepare_full_layer_params(weight, bias, param_dtype=param_dtype)
    return full_layer_apply(x, wp, bp, weight.shape[0], **kwargs)


# ----------------------------------------------------------------------------- demo
if __name__ == "__main__":
    class_num = 3
    feature_num = 32
    batch = 8

    key = jax.random.PRNGKey(0)
    kx, kw, kb, kx2, kx3, kw3, kb3 = jax.random.split(key, 7)

    # nn.Linear-style uniform(-1/sqrt(fan_in), +1/sqrt(fan_in)) init.
    bound = 1.0 / (feature_num ** 0.5)
    weight = jax.random.uniform(kw, (class_num, feature_num), jnp.float32, -bound, bound)
    bias = jax.random.uniform(kb, (class_num,), jnp.float32, -bound, bound)
    x = jax.random.normal(kx, (batch, feature_num), jnp.float32)

    # Hoisted parameter prep (computed once, reused below).
    wp, bp = prepare_full_layer_params(weight, bias)

    # Path 1: small problem -> grid-less single-block kernel.
    y = jax.block_until_ready(full_layer_apply(x, wp, bp, class_num))
    y_ref = x @ weight.T + bias
    assert y.shape == (batch, class_num)
    assert jnp.allclose(y, y_ref, atol=1e-5, rtol=1e-5)

    # Path 2: tiled (B, C) kernel with single-buffered grid-invariant weight/bias.
    x2 = jax.random.normal(kx2, (16, feature_num), jnp.float32)
    y2 = jax.block_until_ready(full_layer_apply(x2, wp, bp, class_num, force_tiled=True))
    y2_ref = x2 @ weight.T + bias
    assert y2.shape == (16, class_num)
    assert jnp.allclose(y2, y2_ref, atol=1e-5, rtol=1e-5)

    # Path 3: K-tiled reduction (accumulator + pl.when init/finalize), 2 K steps.
    feature_num3 = 256
    bound3 = 1.0 / (feature_num3 ** 0.5)
    weight3 = jax.random.uniform(kw3, (class_num, feature_num3), jnp.float32, -bound3, bound3)
    bias3 = jax.random.uniform(kb3, (class_num,), jnp.float32, -bound3, bound3)
    x3 = jax.random.normal(kx3, (16, feature_num3), jnp.float32)
    wp3, bp3 = prepare_full_layer_params(weight3, bias3)
    y3 = jax.block_until_ready(
        full_layer_apply(x3, wp3, bp3, class_num, tile_overrides=(16, 128, 128)))
    y3_ref = x3 @ weight3.T + bias3
    assert y3.shape == (16, class_num)
    assert jnp.allclose(y3, y3_ref, atol=1e-5, rtol=1e-5)

    print("KERNEL_OK")
</pallas_src>

<mosaic_0001>
module attributes {stable_mosaic.version = 11 : i64} {
  func.func @_linear_bias_kernel(%arg0: memref<8x128xf32, #tpu.memory_space<vmem>>, %arg1: memref<128x128xf32, #tpu.memory_space<vmem>>, %arg2: memref<1x128xf32, #tpu.memory_space<vmem>>, %arg3: memref<8x128xf32, #tpu.memory_space<vmem>>) attributes {dimension_semantics = [], scalar_prefetch = 0 : i64, scratch_operands = 0 : i64, tpu.core_type = #tpu.core_type<tc>} {
    %c0 = arith.constant 0 : index
    %c0_0 = arith.constant 0 : index
    %0 = vector.load %arg0[%c0, %c0_0] : memref<8x128xf32, #tpu.memory_space<vmem>>, vector<8x128xf32>
    %c0_1 = arith.constant 0 : index
    %c0_2 = arith.constant 0 : index
    %1 = vector.load %arg1[%c0_1, %c0_2] : memref<128x128xf32, #tpu.memory_space<vmem>>, vector<128x128xf32>
    %cst = arith.constant dense<0.000000e+00> : vector<8x128xf32>
    %2 = tpu.matmul %0, %1, %cst {dimension_numbers = #tpu.dot_dimension_numbers<[1], [0], [0], [1], [0, 0, 1, 1], [], []>} : vector<8x128xf32>, vector<128x128xf32>, vector<8x128xf32> -> vector<8x128xf32>
    %c0_3 = arith.constant 0 : index
    %c0_4 = arith.constant 0 : index
    %3 = vector.load %arg2[%c0_3, %c0_4] : memref<1x128xf32, #tpu.memory_space<vmem>>, vector<1x128xf32>
    %4 = vector.broadcast %3 : vector<1x128xf32> to vector<8x128xf32>
    %5 = arith.addf %2, %4 : vector<8x128xf32>
    %c0_5 = arith.constant 0 : index
    %c0_6 = arith.constant 0 : index
    %6 = vector.load %arg3[%c0_5, %c0_6] : memref<8x128xf32, #tpu.memory_space<vmem>>, vector<8x128xf32>
    tpu.vector_store %arg3[%c0_5, %c0_6], %5 {strides = array<i32>} : memref<8x128xf32, #tpu.memory_space<vmem>>, vector<8x128xf32>,
    return
  }
}

</mosaic_0001>

<bundles_post_ra>
// kernel: tpu_custom_call.1
= control target key start
LH: loop header
LB: loop body
LE: loop exit
PB: predicated region body
PF: predicated region fallthrough
CT: control target
= control target key end

     0   :  { %8 = vsyncpa [#allocation3], 0  ;;  %s383_s0 = inlined_call_operand.hbm [shape: f32[8,128], index: 0, kind: input, shape index: {}]   ;;  %s384_s1 = inlined_call_operand.hbm [shape: f32[128,128], index: 1, kind: input, shape index: {}]   ;;  %s385_s2 = inlined_call_operand.vmem [shape: f32[1,128], index: 2, kind: input, shape index: {}]   ;;  %s386_s3 = inlined_call_operand.hbm [shape: f32[8,128], index: 3, kind: output, shape index: {}]  }
   0x1   :  { %9 = vsyncpa [#allocation6], 0 }
   0x2   :  { %10 = vsyncpa [#allocation4], 0  ;;  %s309_s12 = smov [#allocation2]   ;;  %s310_s14 = smov [#allocation5]  }
   0x3   :  { %s17_s13 = sshll.u32 %s309_s12, 4  ;;  %s26_s15 = sshll.u32 %s310_s14, 4  ;;  %s18_s13 = int_to_ptr.vmem [resolvable:$true] %s17_s13  ;;  %s337_s15 = int_to_ptr.vmem [resolvable:$true] %s26_s15 }
   0x4   :  { %s237_s18 = scalar_lea.hbm %s383_s0, 128 }
   0x5   :  { %p238_p0 = scmp.ne.s32.totalorder %s383_s0, %s237_s18  ;;  %p241_p1 = scmp.lt.u32.totalorder %s237_s18, %s383_s0 }
   0x7   :  { %p243_p2 = pnand %p241_p1, %p238_p0 }
   0x9   :  { %246 = shalt.err (!%p243_p2)
}
   0xa   :  { %s247_s23 = scalar_lea.vmem %s18_s13, 128  ;;  %p252_p4 = scmp.lt.s32.totalorder %s18_s13, %s18_s13 }
   0xb   :  { %p248_p3 = scmp.ne.s32.totalorder %s18_s13, %s247_s23  ;;  %p253_p5 = scmp.lt.s32.totalorder %s247_s23, %s247_s23 }
   0xd   :  { %p254_p6 = por %p253_p5, %p252_p4 }
   0xf   :  { %p255_p7 = pnand %p254_p6, %p248_p3 }
  0x11   :  { %258 = shalt.err (!%p255_p7)
}
  0x12   :  { %20 = dma.hbm_to_vmem [thread:$0]  %s383_s0, 128, %s18_s13, [#allocation3]  }
  0x13   :  { %s259_s28 = scalar_lea.hbm %s384_s1, 2048 }
  0x14   :  { %p260_p8 = scmp.ne.s32.totalorder %s384_s1, %s259_s28  ;;  %p263_p9 = scmp.lt.u32.totalorder %s259_s28, %s384_s1 }
  0x16   :  { %p265_p10 = pnand %p263_p9, %p260_p8 }
  0x18   :  { %268 = shalt.err (!%p265_p10)
}
  0x19   :  { %s269_s6 = scalar_lea.vmem %s337_s15, 2048  ;;  %p274_p12 = scmp.lt.s32.totalorder %s337_s15, %s337_s15 }
  0x1a   :  { %p270_p11 = scmp.ne.s32.totalorder %s337_s15, %s269_s6  ;;  %p275_p13 = scmp.lt.s32.totalorder %s269_s6, %s269_s6 }
  0x1c   :  { %p276_p0 = por %p275_p13, %p274_p12 }
  0x1e   :  { %p277_p1 = pnand %p276_p0, %p270_p11 }
  0x20   :  { %280 = shalt.err (!%p277_p1)
}
  0x21   :  { %s311_s0 = smov 128   ;;  %s312_s7 = smov 8  }
  0x22   :  { %32 = dma.hbm_to_vmem [thread:$0]  %s384_s1, 2048, %s337_s15, [#allocation6], %s311_s0, %s311_s0, %s312_s7  }
  0x23   :  { %303 = dma.done.wait [#allocation3], 128  }
  0x24   :  { %304 = vsyncadd [#allocation3], 4294967168 }
  0x25   :  { %305 = dma.done.wait [#allocation6], 2048  }
  0x26   :  { %306 = vsyncadd [#allocation6], 4294965248  ;;  %v313_v0 = vmov 0.0|0.0   ;;  %vm314_vm0 = vmmov 0   ;;  %v315_v1 = vmov 0.0   ;;  %v42_v2 = vld [vmem:[#allocation5] sm:$0xff] }
  0x27   :  { %205 = vmatprep.subr.bf16.mxu0 %v313_v0  ;;  %202 = vmatprep.mubr.msk.f32.mxu0 %vm314_vm0, %v315_v1  ;;  %v43_v3 = vld [vmem:[#allocation5 + $0x8] sm:$0xff]  ;;  %v44_v4 = vld [vmem:[#allocation5 + $0x10] sm:$0xff]  ;;  %v45_v6 = vld [vmem:[#allocation5 + $0x18] sm:$0xff]  ;;  %s316_s11 = smov [#allocation7]  }
  0x28   :  { %v206_v5 = vpack.c.bf16 %v43_v3, %v42_v2  ;;  %v209_v7 = vpack.c.bf16 %v45_v6, %v44_v4  ;;  %v46_v8 = vld [vmem:[#allocation5 + $0x20] sm:$0xff]  ;;  %v47_v9 = vld [vmem:[#allocation5 + $0x28] sm:$0xff]  ;;  %v48_v11 = vld [vmem:[#allocation5 + $0x30] sm:$0xff]  ;;  %s142_s12 = sshll.u32 %s316_s11, 4  ;;  %s143_s12 = int_to_ptr.vmem [resolvable:$true] %s142_s12 }
  0x29   :  { %v212_v10 = vpack.c.bf16 %v47_v9, %v46_v8  ;;  %v49_v12 = vld [vmem:[#allocation5 + $0x38] sm:$0xff]  ;;  %v50_v14 = vld [vmem:[#allocation5 + $0x40] sm:$0xff]  ;;  %v51_v15 = vld [vmem:[#allocation5 + $0x48] sm:$0xff]  ;;  %s281_s13 = scalar_lea.vmem %s143_s12, 128  ;;  %p286_p3 = scmp.lt.s32.totalorder %s143_s12, %s143_s12 }
  0x2a   :  { %207 = vmatpush3.bf16.msra.mxu0 %v206_v5  ;;  %v215_v13 = vpack.c.bf16 %v49_v12, %v48_v11  ;;  %v218_v16 = vpack.c.bf16 %v51_v15, %v50_v14  ;;  %v52_v17 = vld [vmem:[#allocation5 + $0x50] sm:$0xff]  ;;  %v53_v18 = vld [vmem:[#allocation5 + $0x58] sm:$0xff]  ;;  %v54_v20 = vld [vmem:[#allocation5 + $0x60] sm:$0xff]  ;;  %p282_p2 = scmp.ne.s32.totalorder %s143_s12, %s281_s13  ;;  %p287_p4 = scmp.lt.s32.totalorder %s281_s13, %s281_s13 }
  0x2b   :  { %208 = vmatprep.subr.bf16.mxu0 %v313_v0  ;;  %v221_v19 = vpack.c.bf16 %v53_v18, %v52_v17  ;;  %v55_v21 = vld [vmem:[#allocation5 + $0x68] sm:$0xff]  ;;  %v56_v23 = vld [vmem:[#allocation5 + $0x70] sm:$0xff]  ;;  %v57_v24 = vld [vmem:[#allocation5 + $0x78] sm:$0xff] }
  0x2c   :  { %v224_v22 = vpack.c.bf16 %v55_v21, %v54_v20  ;;  %v227_v25 = vpack.c.bf16 %v57_v24, %v56_v23  ;;  %v41_v26 = vld [vmem:[#allocation2] sm:$0xff]  ;;  %p288_p5 = por %p287_p4, %p286_p3 }
  0x2d   :  { %v152_v27 = vld [vmem:[%s385_s2] ss:$0 sm:$0xff] }
  0x2e   :  { %210 = vmatpush3.bf16.msra.mxu0 %v209_v7  ;;  %p289_p6 = pnand %p288_p5, %p282_p2 }
  0x2f   :  { %211 = vmatprep.subr.bf16.mxu0 %v313_v0 }
  0x32   :  { %213 = vmatpush3.bf16.msra.mxu0 %v212_v10 }
  0x33   :  { %214 = vmatprep.subr.bf16.mxu0 %v313_v0 }
  0x36   :  { %216 = vmatpush3.bf16.msra.mxu0 %v215_v13 }
  0x37   :  { %217 = vmatprep.subr.bf16.mxu0 %v313_v0 }
  0x3a   :  { %219 = vmatpush3.bf16.msra.mxu0 %v218_v16 }
  0x3b   :  { %220 = vmatprep.subr.bf16.mxu0 %v313_v0 }
  0x3e   :  { %222 = vmatpush3.bf16.msra.mxu0 %v221_v19 }
  0x3f   :  { %223 = vmatprep.subr.bf16.mxu0 %v313_v0 }
  0x42   :  { %225 = vmatpush3.bf16.msra.mxu0 %v224_v22 }
  0x43   :  { %226 = vmatprep.subr.bf16.mxu0 %v313_v0 }
  0x46   :  { %228 = vmatpush3.bf16.msra.mxu0 %v227_v25 }
  0x49   :  { %203 = vmatmul.mubr.f32.vlgmr.msra.gmra.mrb[0].mxu0 %v41_v26 }
 0x11c   :  { %v131_v28 = vpop.f32.mrb[0].mxu0 }
 0x11d   :  { %v132_v29 = vadd.f32 %v152_v27, %v131_v28  ;;  %v204_v30 = vpop.f32.mrb[1].mxu0 }
 0x11f   :  { %135 = vst [vmem:[#allocation7] sm:$0xff] %v132_v29 }
 0x120   :  { %292 = shalt.err (!%p289_p6)
}
 0x121   :  { %s293_s16 = scalar_lea.hbm %s386_s3, 128 }
 0x122   :  { %p294_p7 = scmp.ne.s32.totalorder %s386_s3, %s293_s16  ;;  %p297_p8 = scmp.lt.u32.totalorder %s293_s16, %s386_s3 }
 0x124   :  { %p299_p9 = pnand %p297_p8, %p294_p7 }
 0x126   :  { %302 = shalt.err (!%p299_p9)
}
 0x127   :  { %145 = dma.vmem_to_hbm [thread:$0]  %s143_s12, 128, %s386_s3, [#allocation4]  }
 0x128   :  { %307 = dma.done.wait [#allocation4], 128  }
 0x129   :  { %308 = vsyncadd [#allocation4], 4294967168 }
 0x12a   :  { %149 = vsyncpa [#allocation3], 1 }
 0x12b   :  { %150 = vsyncpa [#allocation6], 1 }
 0x12c   :  { %151 = vsyncpa [#allocation4], 1 }

</bundles_post_ra>
